<compile_context>
chip_gen: v7x
topology: tpu7x:2x2x1
jax: 0.10.0
libtpu: 0.0.40
codegen_flags: <defaults>
</compile_context>

<pallas_src>
import functools

import jax
import jax.numpy as jnp
from jax import lax
from jax.experimental import pallas as pl
from jax.experimental.pallas import tpu as pltpu


def _round_up(x, m):
    return ((x + m - 1) // m) * m


def _dec_block_kernel(xf_ref, wq_ref, b_ref, o_ref, *, kmax, wp, m_pad):
    """One batch element of the (phase-merged) transposed conv + SiLU.

    xf_ref: (Cin_pad, L_pad)      flattened zero-padded input image (bf16).
    wq_ref: (P*Cout, T*Cin_pad)   folded weights, all phases stacked along rows (bf16).
    b_ref : (P*Cout, 1)           bias tiled per phase (f32).
    o_ref : (P*Cout, M_pad)       lane-dense output slab (f32).
    """
    # im2col on the flat image: tap (jh, jw) is a contiguous lane slice at a static
    # offset jh*Wp + jw.  Built ONCE per image (phases live in the GEMM rows); with
    # Cin padded to the bf16 sublane tile the axis-0 concat is an aligned stack.
    taps = []
    for jh in range(kmax):
        for jw in range(kmax):
            off = jh * wp + jw
            taps.append(xf_ref[:, off:off + m_pad])                 # (Cin_pad, M_pad)
    patches = taps[0] if len(taps) == 1 else jnp.concatenate(taps, axis=0)

    # Single MXU GEMM covering all s*s phases.
    acc = jnp.dot(wq_ref[...], patches,
                  preferred_element_type=jnp.float32)               # (P*Cout, M_pad) f32
    acc = acc + b_ref[...]                                           # bias
    o_ref[...] = (acc * jax.nn.sigmoid(acc)).astype(o_ref.dtype)     # SiLU in f32


@functools.partial(jax.jit, static_argnames=("stride",))
def dec_block(x_nchw, weight, bias, *, stride):
    """Matches torch: nn.Sequential(nn.ConvTranspose2d(Cin, Cout, K, stride), nn.SiLU()).

    x_nchw : (N, Cin, H, W)    float32
    weight : (Cin, Cout, K, K) float32 (PyTorch ConvTranspose2d layout)
    bias   : (Cout,)           float32
    returns: (N, Cout, OH, OW) float32, OH = (H-1)*stride + K
    """
    N, Cin, H, W = x_nchw.shape
    _, Cout, K, _ = weight.shape
    s = int(stride)

    Kmax = -(-K // s)                  # taps per phase per spatial dim (ceil(K/s))
    P = s * s                          # number of sub-pixel phases
    T = Kmax * Kmax
    pad = Kmax - 1
    Hp, Wp = H + 2 * pad, W + 2 * pad
    Q = H - 1 + Kmax                   # per-phase output rows computed
    M = Q * Wp                         # per-phase flat output length
    M_pad = _round_up(M, 128)          # lane-dense output slab
    L_pad = pad * Wp + pad + M_pad     # flat input length; last tap slice ends exactly here
    OH = (H - 1) * s + K
    OW = (W - 1) * s + K
    Cin_pad = _round_up(Cin, 16)       # bf16 sublane tile

    # ---- glue: pad channels + spatial, flatten, pad lane tail (channel-major, no
    #      layout-hostile transposes), cast to bf16 for the MXU.
    xp = jnp.pad(x_nchw, ((0, 0), (0, Cin_pad - Cin), (pad, pad), (pad, pad)))
    xf = xp.reshape(N, Cin_pad, Hp * Wp)
    xf = jnp.pad(xf, ((0, 0), (0, 0), (0, L_pad - Hp * Wp)))
    xf = xf.astype(jnp.bfloat16)

    # ---- glue: fold the ConvTranspose2d weight into one phase-merged GEMM weight.
    #      wq[(p*Cout+co), (jh*Kmax+jw)*Cin_pad + ci]
    #        = weight[ci, co, (Kmax-1-jh)*s + ph, (Kmax-1-jw)*s + pw]
    #      (kernel taps >= K are zero; keeps all phases uniform).
    w_pad = jnp.pad(weight, ((0, Cin_pad - Cin), (0, 0),
                             (0, Kmax * s - K), (0, Kmax * s - K)))
    phase_w = []
    for ph in range(s):
        for pw in range(s):
            tap_list = []
            for jh in range(Kmax):
                for jw in range(Kmax):
                    kh = (Kmax - 1 - jh) * s + ph
                    kw = (Kmax - 1 - jw) * s + pw
                    tap_list.append(w_pad[:, :, kh, kw])             # (Cin_pad, Cout)
            wmat = jnp.stack(tap_list, axis=0).reshape(T * Cin_pad, Cout)
            phase_w.append(wmat.T)                                   # (Cout, T*Cin_pad)
    wq = jnp.stack(phase_w, axis=0).reshape(P * Cout, T * Cin_pad).astype(jnp.bfloat16)
    b2 = jnp.tile(bias.astype(jnp.float32), P).reshape(P * Cout, 1)

    kernel = functools.partial(_dec_block_kernel, kmax=Kmax, wp=Wp, m_pad=M_pad)
    yflat = pl.pallas_call(
        kernel,
        out_shape=jax.ShapeDtypeStruct((N, P * Cout, M_pad), jnp.float32),
        grid_spec=pltpu.PrefetchScalarGridSpec(
            num_scalar_prefetch=0,
            grid=(N,),
            in_specs=[
                # one flattened image per grid step
                pl.BlockSpec((None, Cin_pad, L_pad), lambda n: (n, 0, 0)),
                # folded weights: VMEM-resident (constant block index)
                pl.BlockSpec((P * Cout, T * Cin_pad), lambda n: (0, 0)),
                # bias: resident
                pl.BlockSpec((P * Cout, 1), lambda n: (0, 0)),
            ],
            out_specs=pl.BlockSpec((None, P * Cout, M_pad), lambda n: (n, 0, 0)),
        ),
        compiler_params=pltpu.CompilerParams(
            dimension_semantics=("parallel",),       # batch blocks shard across TCs
            vmem_limit_bytes=32 * 1024 * 1024,       # safe on v7x's 64 MiB physical VMEM
        ),
    )(xf, wq, b2)

    # ---- glue: crop the lane padding and interleave the s*s phases back into the
    #      full-resolution NCHW output with ONE depth-to-space reshape + crop.
    y = yflat[:, :, :M].reshape(N, s, s, Cout, Q, Wp)    # (N, ph, pw, Cout, Q, Wp)
    y = jnp.transpose(y, (0, 3, 4, 1, 5, 2))             # (N, Cout, Q, ph, Wp, pw)
    y = y.reshape(N, Cout, Q * s, Wp * s)
    return y[:, :, :OH, :OW]


def _reference(x_nchw, weight, bias, *, stride):
    """Pure-JAX reference for ConvTranspose2d + SiLU (same bf16 rounding of inputs)."""
    _, Cout, K, _ = weight.shape
    xb = x_nchw.astype(jnp.bfloat16).astype(jnp.float32)
    wb = weight.astype(jnp.bfloat16).astype(jnp.float32)
    w_oihw = jnp.flip(jnp.transpose(wb, (1, 0, 2, 3)), axis=(2, 3))
    y = lax.conv_general_dilated(
        xb, w_oihw,
        window_strides=(1, 1),
        padding=[(K - 1, K - 1), (K - 1, K - 1)],
        lhs_dilation=(stride, stride),
        dimension_numbers=("NCHW", "OIHW", "NCHW"),
        precision=lax.Precision.HIGHEST)
    y = y + bias.reshape(1, Cout, 1, 1)
    return y * jax.nn.sigmoid(y)


if __name__ == "__main__":
    # DecBlock(in_dim=4, out_dim=8, kernel_size=3, stride=2) on a (2, 4, 16, 16) input.
    key = jax.random.PRNGKey(0)
    k_x, k_w, k_b = jax.random.split(key, 3)

    N, Cin, H, W = 2, 4, 16, 16
    Cout, K, stride = 8, 3, 2

    x = jax.random.normal(k_x, (N, Cin, H, W), jnp.float32)
    weight = 0.1 * jax.random.normal(k_w, (Cin, Cout, K, K), jnp.float32)
    bias = 0.1 * jax.random.normal(k_b, (Cout,), jnp.float32)

    out = dec_block(x, weight, bias, stride=stride)
    out = jax.block_until_ready(out)

    ref = _reference(x, weight, bias, stride=stride)
    assert out.shape == (N, Cout, (H - 1) * stride + K, (W - 1) * stride + K), out.shape
    max_err = float(jnp.max(jnp.abs(out - ref)))
    assert jnp.allclose(out, ref, atol=1e-4, rtol=1e-4), f"mismatch vs reference: {max_err}"

    print("KERNEL_OK")
</pallas_src>

<mosaic_0001>
module attributes {stable_mosaic.version = 11 : i64} {
  func.func @_dec_block_kernel(%arg0: i32, %arg1: memref<1x16x403xbf16, #tpu.memory_space<vmem>>, %arg2: memref<32x64xbf16, #tpu.memory_space<vmem>>, %arg3: memref<32x1xf32, #tpu.memory_space<vmem>>, %arg4: memref<1x32x384xf32, #tpu.memory_space<vmem>>) attributes {dimension_semantics = [#tpu.dimension_semantics<parallel>], iteration_bounds = array<i64: 2>, scalar_prefetch = 0 : i64, scratch_operands = 0 : i64, tpu.core_type = #tpu.core_type<tc>, window_params = [{transform_indices = @transform_0, window_bounds = array<i64: 1, 16, 403>}, {pipeline_mode = #tpu.pipeline_mode<synchronous>, transform_indices = @transform_1, window_bounds = array<i64: 32, 64>}, {pipeline_mode = #tpu.pipeline_mode<synchronous>, transform_indices = @transform_2, window_bounds = array<i64: 32, 1>}, {transform_indices = @transform_3, window_bounds = array<i64: 1, 32, 384>}]} {
    %c0 = arith.constant 0 : index
    %c0_0 = arith.constant 0 : index
    %c0_1 = arith.constant 0 : index
    %0 = vector.load %arg1[%c0, %c0_0, %c0_1] : memref<1x16x403xbf16, #tpu.memory_space<vmem>>, vector<1x16x384xbf16>
    %1 = vector.shape_cast %0 : vector<1x16x384xbf16> to vector<16x384xbf16>
    %c0_2 = arith.constant 0 : index
    %c0_3 = arith.constant 0 : index
    %c1 = arith.constant 1 : index
    %2 = vector.load %arg1[%c0_2, %c0_3, %c1] : memref<1x16x403xbf16, #tpu.memory_space<vmem>>, vector<1x16x384xbf16>
    %3 = vector.shape_cast %2 : vector<1x16x384xbf16> to vector<16x384xbf16>
    %c0_4 = arith.constant 0 : index
    %c0_5 = arith.constant 0 : index
    %c18 = arith.constant 18 : index
    %4 = vector.load %arg1[%c0_4, %c0_5, %c18] : memref<1x16x403xbf16, #tpu.memory_space<vmem>>, vector<1x16x384xbf16>
    %5 = vector.shape_cast %4 : vector<1x16x384xbf16> to vector<16x384xbf16>
    %c0_6 = arith.constant 0 : index
    %c0_7 = arith.constant 0 : index
    %c19 = arith.constant 19 : index
    %6 = vector.load %arg1[%c0_6, %c0_7, %c19] : memref<1x16x403xbf16, #tpu.memory_space<vmem>>, vector<1x16x384xbf16>
    %7 = vector.shape_cast %6 : vector<1x16x384xbf16> to vector<16x384xbf16>
    %8 = tpu.concatenate %1, %3, %5, %7 in 0 : vector<16x384xbf16>, vector<16x384xbf16>, vector<16x384xbf16>, vector<16x384xbf16> -> vector<64x384xbf16>
    %c0_8 = arith.constant 0 : index
    %c0_9 = arith.constant 0 : index
    %9 = vector.load %arg2[%c0_8, %c0_9] : memref<32x64xbf16, #tpu.memory_space<vmem>>, vector<32x64xbf16>
    %cst = arith.constant dense<0.000000e+00> : vector<32x384xf32>
    %10 = tpu.matmul %9, %8, %cst {dimension_numbers = #tpu.dot_dimension_numbers<[1], [0], [0], [1], [0, 0, 1, 1], [], []>} : vector<32x64xbf16>, vector<64x384xbf16>, vector<32x384xf32> -> vector<32x384xf32>
    %c0_10 = arith.constant 0 : index
    %c0_11 = arith.constant 0 : index
    %11 = vector.load %arg3[%c0_10, %c0_11] : memref<32x1xf32, #tpu.memory_space<vmem>>, vector<32x1xf32>
    %12 = vector.broadcast %11 : vector<32x1xf32> to vector<32x384xf32>
    %13 = arith.addf %10, %12 : vector<32x384xf32>
    %14 = arith.negf %13 : vector<32x384xf32>
    %15 = math.exp %14 : vector<32x384xf32>
    %cst_12 = arith.constant 1.000000e+00 : f32
    %16 = vector.broadcast %cst_12 : f32 to vector<32x384xf32>
    %17 = arith.addf %16, %15 : vector<32x384xf32>
    %18 = arith.divf %16, %17 : vector<32x384xf32>
    %19 = arith.mulf %13, %18 : vector<32x384xf32>
    %c0_13 = arith.constant 0 : index
    %c0_14 = arith.constant 0 : index
    %c0_15 = arith.constant 0 : index
    %20 = vector.load %arg4[%c0_13, %c0_14, %c0_15] : memref<1x32x384xf32, #tpu.memory_space<vmem>>, vector<1x32x384xf32>
    %21 = vector.shape_cast %20 : vector<1x32x384xf32> to vector<32x384xf32>
    %22 = vector.shape_cast %19 : vector<32x384xf32> to vector<1x32x384xf32>
    tpu.vector_store %arg4[%c0_13, %c0_14, %c0_15], %22 {strides = array<i32>} : memref<1x32x384xf32, #tpu.memory_space<vmem>>, vector<1x32x384xf32>,
    return
  }
  func.func @transform_0(%arg0: i32) -> (i32, i32, i32) {
    %c0_i32 = arith.constant 0 : i32
    %c0_i32_0 = arith.constant 0 : i32
    %c0_i32_1 = arith.constant 0 : i32
    return %arg0, %c0_i32, %c0_i32_0 : i32, i32, i32
  }
  func.func @transform_1(%arg0: i32) -> (i32, i32) {
    %c0_i32 = arith.constant 0 : i32
    %c0_i32_0 = arith.constant 0 : i32
    %c0_i32_1 = arith.constant 0 : i32
    return %c0_i32, %c0_i32_0 : i32, i32
  }
  func.func @transform_2(%arg0: i32) -> (i32, i32) {
    %c0_i32 = arith.constant 0 : i32
    %c0_i32_0 = arith.constant 0 : i32
    %c0_i32_1 = arith.constant 0 : i32
    return %c0_i32, %c0_i32_0 : i32, i32
  }
  func.func @transform_3(%arg0: i32) -> (i32, i32, i32) {
    %c0_i32 = arith.constant 0 : i32
    %c0_i32_0 = arith.constant 0 : i32
    %c0_i32_1 = arith.constant 0 : i32
    return %arg0, %c0_i32, %c0_i32_0 : i32, i32, i32
  }
}

</mosaic_0001>

<bundles_post_ra>
// kernel: tile.8
= control target key start
LH: loop header
LB: loop body
LE: loop exit
PB: predicated region body
PF: predicated region fallthrough
CT: control target
= control target key end

     0   :  { %2 = vsyncpa [#allocation1], 0  ;;  %s44_s6 = smov [#allocation0]   ;;  %s70_s0 = inlined_call_operand.hbm [shape: f32[8], index: 0, kind: input, shape index: {}]   ;;  %s71_s1 = inlined_call_operand.vmem [shape: f32[4,8], index: 1, kind: output, shape index: {}]  }
   0x1   :  { %s9_s7 = sshll.u32 %s44_s6, 4  ;;  %s20_s10 = scalar_lea.hbm %s70_s0, 16  ;;  %s10_s7 = int_to_ptr.vmem [resolvable:$true] %s9_s7 }
   0x2   :  { %p21_p0 = scmp.ne.s32.totalorder %s70_s0, %s20_s10  ;;  %p24_p1 = scmp.lt.u32.totalorder %s20_s10, %s70_s0 }
   0x4   :  { %p26_p2 = pnand %p24_p1, %p21_p0 }
   0x6   :  { %29 = shalt.err (!%p26_p2)
}
   0x7   :  { %s30_s15 = scalar_lea.vmem %s10_s7, 16  ;;  %s34_s16 = scalar_lea.vmem %s10_s7, 32 }
   0x8   :  { %p31_p3 = scmp.ne.s32.totalorder %s10_s7, %s30_s15  ;;  %p35_p4 = scmp.lt.s32.totalorder %s10_s7, %s10_s7 }
   0x9   :  { %p36_p5 = scmp.lt.s32.totalorder %s34_s16, %s30_s15 }
   0xb   :  { %p37_p6 = por %p36_p5, %p35_p4 }
   0xd   :  { %p38_p7 = pnand %p37_p6, %p31_p3 }
   0xf   :  { %41 = shalt.err (!%p38_p7)
}
  0x10   :  { %12 = dma.hbm_to_vmem [thread:$0]  %s70_s0, 16, %s10_s7, [#allocation1]  }
  0x11   :  { %42 = dma.done.wait [#allocation1], 16  }
  0x12   :  { %43 = vsyncadd [#allocation1], 4294967280  ;;  %v16_v0 = vld [vmem:[#allocation0] ss:$0 sm:$0xff] }
  0x13   :  { %17 = vst [vmem:[%s71_s1] sm:$0xf] %v16_v0 }
  0x14   :  { %18 = vsyncpa [#allocation1], 1 }

// kernel: tile.0
= control target key start
LH: loop header
LB: loop body
LE: loop exit
PB: predicated region body
PF: predicated region fallthrough
CT: control target
= control target key end

     0   :  { %s66_s8 = smov 125   ;;  %vm7_vm0 = vcmask 7168   ;;  %s67_s11 = smov 126   ;;  %s117_s0 = inlined_call_operand.vmem [shape: f32[4,8], index: 0, kind: input, shape index: {}]   ;;  %s118_s1 = inlined_call_operand.vmem [shape: f32[32,1], index: 1, kind: output, shape index: {}]  }
   0x1   :  { %v4_v0 = vld [vmem:[%s117_s0] sm:$0xf]  ;;  %s65_s0 = smov 127   ;;  %s68_s12 = smov 124  }
   0x2   :  { %5 = vst [vmem:[#allocation0] sm:$0xf] %v4_v0  ;;  %s69_s13 = smov 123   ;;  %s70_s14 = smov 122  }
   0x3   :  { %s71_s15 = smov 121  }
   0x9   :  { %v9_v1 = vld [vmem:[#allocation0] sm:$0xf]  }
   0xa   :  { %v21_v2 = vld [vmem:[#allocation0] sm:$0xf]   ;;  %10 = vrot.lane.b32.xlu0 %v9_v1, %s65_s0 }
   0xb   :  { %22 = vrot.lane.b32.xlu1 %v21_v2, %s66_s8  ;;  %v15_v3 = vld [vmem:[#allocation0] sm:$0xf]  }
   0xc   :  { %v27_v4 = vld [vmem:[#allocation0] sm:$0xf]  }
   0xd   :  { %v6_v5 = vld [vmem:[#allocation0] sm:$0xf]  }
   0xe   :  { %8 = vst.msk [vmem:[%s118_s1] ss:$8 sm:$0xf] %vm7_vm0, %v6_v5   ;;  %16 = vrot.lane.b32.xlu0 %v15_v3, %s67_s11  ;;  %v33_v6 = vld [vmem:[#allocation0] sm:$0xf]  }
   0xf   :  { %28 = vrot.lane.b32.xlu1 %v27_v4, %s68_s12  ;;  %v39_v7 = vld [vmem:[#allocation0] sm:$0xf]  }
  0x10   :  { %v45_v8 = vld [vmem:[#allocation0] sm:$0xf]  }
  0x12   :  { %34 = vrot.lane.b32.xlu0 %v33_v6, %s69_s13 }
  0x13   :  { %40 = vrot.lane.b32.xlu1 %v39_v7, %s70_s14 }
  0x16   :  { %46 = vrot.lane.b32.xlu0 %v45_v8, %s71_s15 }
  0x7c   :  { %v11_v9 = vpop.permute.xlu0 %10  }
  0x7d   :  { %v23_v10 = vpop.permute.xlu1 %22   ;;  %51 = vst.msk [vmem:[%s118_s1 + $0x1] ss:$8 sm:$0xf] %vm7_vm0, %v11_v9  }
  0x7e   :  { %53 = vst.msk [vmem:[%s118_s1 + $0x3] ss:$8 sm:$0xf] %vm7_vm0, %v23_v10  }
  0x80   :  { %v17_v11 = vpop.permute.xlu0 %16  }
  0x81   :  { %v29_v12 = vpop.permute.xlu1 %28   ;;  %52 = vst.msk [vmem:[%s118_s1 + $0x2] ss:$8 sm:$0xf] %vm7_vm0, %v17_v11  }
  0x82   :  { %54 = vst.msk [vmem:[%s118_s1 + $0x4] ss:$8 sm:$0xf] %vm7_vm0, %v29_v12  }
  0x84   :  { %v35_v13 = vpop.permute.xlu0 %34  }
  0x85   :  { %v41_v14 = vpop.permute.xlu1 %40   ;;  %55 = vst.msk [vmem:[%s118_s1 + $0x5] ss:$8 sm:$0xf] %vm7_vm0, %v35_v13  }
  0x86   :  { %56 = vst.msk [vmem:[%s118_s1 + $0x6] ss:$8 sm:$0xf] %vm7_vm0, %v41_v14  }
  0x88   :  { %v47_v15 = vpop.permute.xlu0 %46  }
  0x89   :  { %57 = vst.msk [vmem:[%s118_s1 + $0x7] ss:$8 sm:$0xf] %vm7_vm0, %v47_v15  }

// kernel: dec_block.1
= control target key start
LH: loop header
LB: loop body
LE: loop exit
PB: predicated region body
PF: predicated region fallthrough
CT: control target
= control target key end

     0   :  { %s701_s12 = smov 0   ;;  %s812_s0 = inlined_call_operand.vmem [shape: bf16[2,16,403], index: 0, kind: input, shape index: {}]   ;;  %s813_s1 = inlined_call_operand.vmem [shape: bf16[32,64], index: 1, kind: input, shape index: {}]   ;;  %s814_s2 = inlined_call_operand.vmem [shape: f32[32,1], index: 2, kind: input, shape index: {}]   ;;  %s815_s3 = inlined_call_operand.vmem [shape: f32[2,32,384], index: 3, kind: output, shape index: {}]  }
   0x1 LB: > { %s545_s13 = sadd.s32 4294967295, %s675_s12   ;;  %p549_p0 = scmp.ge.s32.totalorder %s675_s12, 1  ;;  %s675_s12 = sphi %s701_s12, %s13_s12  }
   0x2   : > { %p137_p1 = scmp.lt.s32.totalorder %s675_s12, 3 }
   0x4   : > { %p138_p2 = pnand %p549_p0, %p137_p1 }
   0x5   : > { %p161_p3 = scmp.lt.s32.totalorder (!%p138_p2), %s545_s13, 1  ;;  %s677_s18 = smov (!%p138_p2), 127   ;;  %v619_v4 = vld [vmem:[%s813_s1] sm:$0xff] (!%p138_p2)   ;;  %v679_v6 = vmov (!%p138_p2), 0   ;;  %vm285_vm0 = vcmask (!%p138_p2), 523264   ;;  %v252_v8 = vld [vmem:[%s814_s2 + $0x8] sm:$0xff] (!%p138_p2) }
   0x6   : > { %141 = sbr.rel (%p138_p2) target bundleno = 415 (0x19f), region = 32  ;;  %s678_s19 = smov (!%p138_p2), 110   ;;  %324 = vmatprep.mubr.bf16.mxu0 (!%p138_p2), %v679_v6  ;;  %593 = vmatprep.mubr.msk.bf16.mxu1 (!%p138_p2), %vm285_vm0, %v619_v4  ;;  %v251_v7 = vld [vmem:[%s814_s2] sm:$0xff] (!%p138_p2)  ;;  %v254_v9 = vld [vmem:[%s814_s2 + $0x18] sm:$0xff] (!%p138_p2)  ;;  %v253_v10 = vld [vmem:[%s814_s2 + $0x10] sm:$0xff] (!%p138_p2)  ;;  %vm210_vm1 = vcmask (!%p138_p2), 1039360  }
   0x7   : > { %610 = vset.pattern.permute.xlu0 (!%p138_p2), %v679_v6  ;;  %611 = vset.pattern.permute.xlu1 (!%p138_p2), %v679_v6  ;;  %s680_s22 = smov (!%p138_p2), 109   ;;  %vm225_vm2 = vcmask (!%p138_p2), 900096   ;;  %vm240_vm3 = vcmask (!%p138_p2), 891904   ;;  %v620_v32 = vld [vmem:[%s813_s1 + $0x8] sm:$0xff] (!%p138_p2)  }
   0xd   : > { %s817_s13 = smov (!%p161_p3, %s545_s13), 1 }
   0xe   : > { %s578_s14 = sshll.u32 %s817_s13, 5  ;;  %s597_s6 = smul.u32 96, %s817_s13 }
   0xf   : > { %s165_s17 = scalar_lea.vmem %s812_s0, %s578_s14 }
  0x10   : > { %v612_v0 = vld [vmem:[%s165_s17 + $0x4] ss:$16 sps:$4 sm:$0xff]   ;;  %v614_v1 = vld [vmem:[%s165_s17] ss:$16 sps:$4 sm:$0xff]   ;;  %v615_v2 = vld [vmem:[%s165_s17 + $0x8] ss:$16 sps:$4 sm:$0xff]   ;;  %s783_s9 = scalar_lea.vmem %s815_s3, %s597_s6 }
  0x11   : > { %204 = vrot.lane.b32.xlu0 %v612_v0, %s677_s18  ;;  %292 = vmatprep.subr.bf16.mxu0 %v612_v0  ;;  %v618_v3 = vld [vmem:[%s165_s17 + $0x8] ss:$16 sps:$4 sm:$0xff]   ;;  %v617_v5 = vld [vmem:[%s165_s17 + $0xc] ss:$16 sps:$4 sm:$0xff]  }
  0x12   : > { %202 = vrot.lane.b32.xlu1 %v614_v1, %s677_s18  ;;  %293 = vmatpush1.bf16.msra.mxu0 %v614_v1 }
  0x13   : > { %585 = vmatprep.subr.bf16.mxu1 %v618_v3 }
  0x14   : > { %586 = vmatpush3.bf16.msra.mxu1 %v618_v3 }
  0x15   : > { %206 = vrot.lane.b32.xlu0 %v615_v2, %s677_s18 }
  0x16   : > { %219 = vrot.lane.b32.xlu1 %v612_v0, %s678_s19 }
  0x19   : > { %221 = vrot.lane.b32.xlu0 %v615_v2, %s678_s19 }
  0x1a   : > { %217 = vrot.lane.b32.xlu1 %v614_v1, %s678_s19 }
  0x1d   : > { %208 = vrot.lane.b32.xlu0 %v617_v5, %s677_s18 }
  0x1e   : > { %234 = vrot.lane.b32.xlu1 %v612_v0, %s680_s22 }
  0x21   : > { %236 = vrot.lane.b32.xlu0 %v615_v2, %s680_s22 }
  0x22   : > { %232 = vrot.lane.b32.xlu1 %v614_v1, %s680_s22 }
  0x25   : > { %223 = vrot.lane.b32.xlu0 %v617_v5, %s678_s19 }
  0x26   : > { %238 = vrot.lane.b32.xlu1 %v617_v5, %s680_s22 }
  0x29   : > { %257 = vperm.xlu0 %610, %v251_v7  }
  0x2a   : > { %262 = vperm.xlu1 %611, %v252_v8  }
  0x2d   : > { %272 = vperm.xlu0 %610, %v254_v9  }
  0x2e   : > { %267 = vperm.xlu1 %611, %v253_v10  }
  0x83   : > { %v205_v11 = vpop.permute.xlu0 %204 }
  0x84   : > { %v203_v12 = vpop.permute.xlu1 %202 }
  0x85   : > { %v211_v16 = vsel %vm210_vm1, %v203_v12, %v205_v11 }
  0x87   : > { %v207_v13 = vpop.permute.xlu0 %206 }
  0x88   : > { %v220_v14 = vpop.permute.xlu1 %219  ;;  %v212_v15 = vsel %vm210_vm1, %v205_v11, %v207_v13 }
  0x89   : > { %294 = vmatprep.subr.bf16.mxu0 %v212_v15 }
  0x8a   : > { %295 = vmatpush1.bf16.msra.mxu0 %v211_v16 }
  0x8b   : > { %v222_v17 = vpop.permute.xlu0 %221 }
  0x8c   : > { %v218_v18 = vpop.permute.xlu1 %217  ;;  %v227_v19 = vsel %vm225_vm2, %v220_v14, %v222_v17 }
  0x8d   : > { %296 = vmatprep.subr.bf16.mxu0 %v227_v19  ;;  %v226_v20 = vsel %vm225_vm2, %v218_v18, %v220_v14 }
  0x8e   : > { %297 = vmatpush1.bf16.msra.mxu0 %v226_v20 }
  0x8f   : > { %v209_v21 = vpop.permute.xlu0 %208 }
  0x90   : > { %v235_v22 = vpop.permute.xlu1 %234  ;;  %v213_v23 = vsel %vm210_vm1, %v207_v13, %v209_v21 }
  0x91   : > { %587 = vmatprep.subr.bf16.mxu1 %v213_v23 }
  0x92   : > { %588 = vmatpush3.bf16.msra.mxu1 %v213_v23 }
  0x93   : > { %v237_v24 = vpop.permute.xlu0 %236 }
  0x94   : > { %v233_v25 = vpop.permute.xlu1 %232  ;;  %v242_v26 = vsel %vm240_vm3, %v235_v22, %v237_v24 }
  0x95   : > { %298 = vmatprep.subr.bf16.mxu0 %v242_v26  ;;  %v241_v27 = vsel %vm240_vm3, %v233_v25, %v235_v22 }
  0x96   : > { %299 = vmatpush1.bf16.msra.mxu0 %v241_v27 }
  0x97   : > { %v224_v28 = vpop.permute.xlu0 %223 }
  0x98   : > { %v239_v29 = vpop.permute.xlu1 %238  ;;  %v228_v30 = vsel %vm225_vm2, %v222_v17, %v224_v28 }
  0x99   : > { %560 = vmatmul.mubr.msk.bf16.vlgmr.msra.gmra.mrb[0].mxu0 %vm285_vm0, %v619_v4  ;;  %589 = vmatprep.subr.bf16.mxu1 %v228_v30  ;;  %v243_v31 = vsel %vm240_vm3, %v237_v24, %v239_v29 }
  0x9a   : > { %590 = vmatpush3.bf16.msra.mxu1 %v228_v30  ;;  %334 = vmatprep.mubr.bf16.mxu0 %v679_v6 }
  0x9b   : > { %591 = vmatprep.subr.bf16.mxu1 %v243_v31 }
  0x9e   : > { %592 = vmatpush3.bf16.msra.mxu1 %v243_v31 }
  0xa1   : > { %561 = vmatmul.mubr.msk.bf16.gmra.mrb[4].mxu0 %vm285_vm0, %v620_v32  ;;  %594 = vmatmul.mubr.msk.bf16.vlgmr.msra.gmra.mrb[0].mxu1 %vm285_vm0, %v620_v32 }
  0xa8   : > { %v258_v33 = vpop.permute.xlu0 %257 }
  0xa9   : > { %v263_v35 = vpop.permute.xlu1 %262 }
  0xac   : > { %v273_v48 = vpop.permute.xlu0 %272 }
  0xad   : > { %v268_v47 = vpop.permute.xlu1 %267 }
 0x16c   : > { %v326_v34 = vpop.f32.mrb[0].mxu0 }
 0x16d   : > { %v743_v36 = vadd.f32 %v326_v34, %v258_v33  ;;  %v328_v37 = vpop.f32.mrb[1].mxu0 }
 0x16e   : > { %v745_v38 = vadd.f32 %v328_v37, %v258_v33  ;;  %v330_v39 = vpop.f32.mrb[2].mxu0 }
 0x16f   : > { %v564_v40 = vmul.f32 -1.442695, %v743_v36  ;;  %v748_v41 = vadd.f32 %v330_v39, %v263_v35  ;;  %v332_v42 = vpop.f32.mrb[3].mxu0 }
 0x170   : > { %v565_v43 = vmul.f32 -1.442695, %v745_v38  ;;  %v751_v44 = vadd.f32 %v332_v42, %v263_v35 }
 0x171   : > { %621 = vpow2.f32 %v564_v40  ;;  %v567_v45 = vmul.f32 -1.442695, %v748_v41 }
 0x172   : > { %623 = vpow2.f32 %v565_v43  ;;  %v568_v46 = vmul.f32 -1.442695, %v751_v44 }
 0x173   : > { %625 = vpow2.f32 %v567_v45 }
 0x174   : > { %627 = vpow2.f32 %v568_v46  ;;  %v336_v49 = vpop.f32.mrb[4].mxu0  ;;  %v595_v50 = vpop.f32.mrb[0].mxu1 }
 0x175   : > { %v755_v51 = vadd.f32 %v336_v49, %v268_v47  ;;  %v757_v52 = vadd.f32 %v595_v50, %v268_v47  ;;  %v338_v53 = vpop.f32.mrb[5].mxu0  ;;  %v379_v54 = vpop.f32.mrb[1].mxu1 }
 0x176   : > { %v759_v55 = vadd.f32 %v338_v53, %v268_v47  ;;  %v761_v56 = vadd.f32 %v379_v54, %v258_v33  ;;  %v340_v57 = vpop.f32.mrb[6].mxu0  ;;  %v596_v58 = vpop.f32.mrb[2].mxu1 }
 0x177   : > { %v570_v59 = vmul.f32 -1.442695, %v755_v51  ;;  %v572_v60 = vmul.f32 -1.442695, %v757_v52  ;;  %v765_v61 = vadd.f32 %v340_v57, %v273_v48  ;;  %v342_v62 = vpop.f32.mrb[7].mxu0  ;;  %v382_v63 = vpop.f32.mrb[3].mxu1  ;;  %v770_v3 = vadd.f32 %v596_v58, %v273_v48 }
 0x178   : > { %v571_v0 = vmul.f32 -1.442695, %v759_v55  ;;  %v566_v1 = vmul.f32 -1.442695, %v761_v56  ;;  %v772_v5 = vadd.f32 %v342_v62, %v273_v48  ;;  %v774_v8 = vadd.f32 %v382_v63, %v263_v35 }
 0x179   : > { %629 = vpow2.f32 %v570_v59  ;;  %v573_v2 = vmul.f32 -1.442695, %v765_v61  ;;  %v575_v13 = vmul.f32 -1.442695, %v770_v3 }
 0x17a   : > { %631 = vpow2.f32 %v572_v60  ;;  %v574_v15 = vmul.f32 -1.442695, %v772_v5  ;;  %v569_v16 = vmul.f32 -1.442695, %v774_v8 }
 0x17b   : > { %v622_v4 = vpop.eup %621  ;;  %633 = vpow2.f32 %v571_v0 }
 0x17c   : > { %v624_v6 = vpop.eup %623  ;;  %v430_v7 = vadd.f32 1.0, %v622_v4  ;;  %635 = vpow2.f32 %v566_v1 }
 0x17d   : > { %v626_v9 = vpop.eup %625  ;;  %v431_v10 = vadd.f32 1.0, %v624_v6  ;;  %637 = vpow2.f32 %v573_v2 }
 0x17e   : > { %v628_v11 = vpop.eup %627  ;;  %639 = vrcp.f32 %v430_v7  ;;  %v433_v12 = vadd.f32 1.0, %v626_v9 }
 0x17f   : > { %641 = vrcp.f32 %v431_v10  ;;  %v434_v14 = vadd.f32 1.0, %v628_v11 }
 0x180   : > { %643 = vrcp.f32 %v433_v12 }
 0x181   : > { %645 = vrcp.f32 %v434_v14 }
 0x182   : > { %647 = vpow2.f32 %v575_v13 }
 0x183   : > { %v630_v17 = vpop.eup %629  ;;  %649 = vpow2.f32 %v574_v15 }
 0x184   : > { %v632_v18 = vpop.eup %631  ;;  %v436_v19 = vadd.f32 1.0, %v630_v17  ;;  %651 = vpow2.f32 %v569_v16 }
 0x185   : > { %v634_v20 = vpop.eup %633  ;;  %v438_v21 = vadd.f32 1.0, %v632_v18 }
 0x186   : > { %v636_v22 = vpop.eup %635  ;;  %653 = vrcp.f32 %v436_v19  ;;  %v437_v23 = vadd.f32 1.0, %v634_v20 }
 0x187   : > { %v638_v24 = vpop.eup %637  ;;  %655 = vrcp.f32 %v438_v21  ;;  %v432_v25 = vadd.f32 1.0, %v636_v22 }
 0x188   : > { %v640_v26 = vpop.eup %639  ;;  %657 = vrcp.f32 %v437_v23  ;;  %v439_v27 = vadd.f32 1.0, %v638_v24 }
 0x189   : > { %v642_v28 = vpop.eup %641  ;;  %v466_v29 = vmul.f32 %v640_v26, %v743_v36  ;;  %659 = vrcp.f32 %v432_v25 }
 0x18a   : > { %v644_v30 = vpop.eup %643  ;;  %v467_v31 = vmul.f32 %v642_v28, %v745_v38  ;;  %661 = vrcp.f32 %v439_v27 }
 0x18b   : > { %v646_v32 = vpop.eup %645  ;;  %478 = vst [vmem:[%s783_s9] sm:$0xff] %v466_v29  ;;  %v469_v33 = vmul.f32 %v644_v30, %v748_v41 }
 0x18c   : > { %v648_v34 = vpop.eup %647  ;;  %479 = vst [vmem:[%s783_s9 + $0x8] sm:$0xff] %v467_v31  ;;  %v470_v35 = vmul.f32 %v646_v32, %v751_v44 }
 0x18d   : > { %v650_v37 = vpop.eup %649  ;;  %481 = vst [vmem:[%s783_s9 + $0x18] sm:$0xff] %v469_v33  ;;  %v441_v39 = vadd.f32 1.0, %v648_v34 }
 0x18e   : > { %v652_v40 = vpop.eup %651  ;;  %482 = vst [vmem:[%s783_s9 + $0x20] sm:$0xff] %v470_v35  ;;  %v440_v36 = vadd.f32 1.0, %v650_v37 }
 0x18f   : > { %663 = vrcp.f32 %v441_v39  ;;  %v435_v38 = vadd.f32 1.0, %v652_v40 }
 0x190   : > { %v654_v42 = vpop.eup %653  ;;  %665 = vrcp.f32 %v440_v36 }
 0x191   : > { %v656_v41 = vpop.eup %655  ;;  %v472_v43 = vmul.f32 %v654_v42, %v755_v51  ;;  %667 = vrcp.f32 %v435_v38 }
 0x192   : > { %v658_v44 = vpop.eup %657  ;;  %v474_v45 = vmul.f32 %v656_v41, %v757_v52 }
 0x193   : > { %v660_v46 = vpop.eup %659  ;;  %484 = vst [vmem:[%s783_s9 + $0x30] sm:$0xff] %v472_v43  ;;  %v473_v47 = vmul.f32 %v658_v44, %v759_v55 }
 0x194   : > { %v662_v48 = vpop.eup %661  ;;  %486 = vst [vmem:[%s783_s9 + $0x40] sm:$0xff] %v474_v45  ;;  %v468_v49 = vmul.f32 %v660_v46, %v761_v56 }
 0x195   : > { %485 = vst [vmem:[%s783_s9 + $0x38] sm:$0xff] %v473_v47  ;;  %v475_v50 = vmul.f32 %v662_v48, %v765_v61 }
 0x196   : > { %480 = vst [vmem:[%s783_s9 + $0x10] sm:$0xff] %v468_v49 }
 0x197   : > { %487 = vst [vmem:[%s783_s9 + $0x48] sm:$0xff] %v475_v50 }
 0x199   : > { %v664_v51 = vpop.eup %663 }
 0x19a   : > { %v666_v53 = vpop.eup %665  ;;  %v477_v52 = vmul.f32 %v664_v51, %v770_v3 }
 0x19b   : > { %v668_v54 = vpop.eup %667  ;;  %v476_v57 = vmul.f32 %v666_v53, %v772_v5 }
 0x19c   : > { %489 = vst [vmem:[%s783_s9 + $0x58] sm:$0xff] %v477_v52  ;;  %v471_v55 = vmul.f32 %v668_v54, %v774_v8 }
 0x19d   : > { %488 = vst [vmem:[%s783_s9 + $0x50] sm:$0xff] %v476_v57 }
 0x19e   : > { %483 = vst [vmem:[%s783_s9 + $0x28] sm:$0xff] %v471_v55 }
 0x19f PF: > { %s13_s12 = sadd.s32 1, %s675_s12  }
 0x1a0   : > { %p10_p4 = scmp.ge.s32.totalorder %s13_s12, 4  }
 0x1a2   :  { %12 = sbr.rel (!%p10_p4) target bundleno = 1 (0x1), region = 62 }

</bundles_post_ra>
